<compile_context>
chip_gen: v7x
topology: tpu7x:2x2x1
jax: 0.10.0
libtpu: 0.0.40
codegen_flags: <defaults>
</compile_context>

<pallas_src>
import jax
import jax.numpy as jnp
from jax.experimental import pallas as pl
from jax.experimental.pallas import tpu as pltpu

AA_LETTERS = '-ACDEFGHIKLMNPQRSTVWYX'
VOCAB_SIZE = len(AA_LETTERS)   # 22
EMBED_DIM = 32
LANES = 128


def _round_up(x, m):
    return (x + m - 1) // m * m


def embed_kernel(sidx_ref, tbd_ref, out_ref):
    """Gather-free embedding lookup: one-hot x block-diagonal table.

    sidx_ref: (TR, G)     int32  token ids; column j is pre-offset by j*V
    tbd_ref:  (K, G*D)    f32    block-diagonal embedding table (VMEM-resident,
                                 K padded to a multiple of 128)
    out_ref:  (TR, G*D)   f32    lane-dense output tile (G*D == 128 when D < 128)
    """
    TR, G = sidx_ref.shape
    K = tbd_ref.shape[0]

    sidx = sidx_ref[...]                                        # (TR, G)
    lane = jax.lax.broadcasted_iota(jnp.int32, (TR, K), 1)      # built once per tile

    # onehot[r, j*V + v] = (idx[r*G + j] == v); per-column ranges are disjoint,
    # padded K rows are never hit (all offsets < G*V).
    hit = lane == sidx[:, 0:1]
    for j in range(1, G):
        hit = jnp.logical_or(hit, lane == sidx[:, j:j + 1])
    onehot = hit.astype(tbd_ref.dtype)                          # (TR, K)

    # (TR, K) @ (K, G*D) -> (TR, G*D); f32 accumulate, exact for 0/1 one-hot.
    out_ref[...] = jnp.dot(
        onehot, tbd_ref[...], preferred_element_type=jnp.float32
    ).astype(out_ref.dtype)


def tcr_embedding(x, table, *, tile_rows=1024):
    """x: [B, S] int, table: [V, D] f32 -> [B, S, D] f32 (nn.Embedding forward)."""
    B, S = x.shape
    V, D = table.shape
    M = B * S

    # Pack G tokens per output row so the stored last dim is 128 lanes.
    if D < LANES and LANES % D == 0:
        G = LANES // D            # D=32 -> G=4, output rows are exactly 128 lanes
    else:
        G = 1                     # D already >= 128 (or awkward): no grouping

    # Flatten token ids; pad with 0 (padding_idx) — padded rows are sliced off.
    flat = x.reshape(M).astype(jnp.int32)
    R = pl.cdiv(M, G)                               # grouped rows
    TR = min(tile_rows, _round_up(R, 8))            # sublane-aligned tile rows
    R_pad = _round_up(R, TR)
    flat = jnp.pad(flat, (0, R_pad * G - M))

    # Column j holds token (r*G + j), shifted by j*V so it selects its own
    # diagonal block of the block-diagonal table.
    sidx = flat.reshape(R_pad, G) + (jnp.arange(G, dtype=jnp.int32) * V)[None, :]

    # Block-diagonal table (G*V, G*D), zero-padded on the contraction dim to a
    # multiple of 128 -> vreg-dense one-hot and MXU-friendly K.  Still tiny
    # (128x128 f32 = 64 KB), kept resident in VMEM via a constant index_map.
    tbd = jnp.kron(jnp.eye(G, dtype=table.dtype), table)
    K = _round_up(G * V, LANES)
    tbd = jnp.pad(tbd, ((0, K - G * V), (0, 0)))

    out = pl.pallas_call(
        embed_kernel,
        out_shape=jax.ShapeDtypeStruct((R_pad, G * D), table.dtype),
        grid=(R_pad // TR,),
        in_specs=[
            pl.BlockSpec((TR, G), lambda i: (i, 0)),        # streamed indices
            pl.BlockSpec((K, G * D), lambda i: (0, 0)),     # resident table
        ],
        out_specs=pl.BlockSpec((TR, G * D), lambda i: (i, 0)),
        compiler_params=pltpu.CompilerParams(
            dimension_semantics=("parallel",),      # shard tiles across TCs (v7x)
            vmem_limit_bytes=32 * 1024 * 1024,      # safe on v5e/v6e/v7x
        ),
    )(sidx, tbd)

    # Row-major (R_pad, G*D) == (R_pad*G, D): drop padding, restore [B, S, D].
    return out.reshape(R_pad * G, D)[:M].reshape(B, S, D)


def init_embedding_table(key, vocab_size=VOCAB_SIZE, embed_dim=EMBED_DIM):
    # nn.Embedding default init: N(0, 1); padding_idx=0 row is zeroed.
    table = jax.random.normal(key, (vocab_size, embed_dim), dtype=jnp.float32)
    table = table.at[0].set(0.0)
    return table


if __name__ == "__main__":
    key = jax.random.PRNGKey(0)
    k_table, k_idx, k_idx2 = jax.random.split(key, 3)

    # Small shapes consistent with the module's forward: batch=2, seq=8, dim=32.
    batch, seq_len = 2, 8
    table = init_embedding_table(k_table)
    x = jax.random.randint(k_idx, (batch, seq_len), 0, VOCAB_SIZE, dtype=jnp.int32)

    out = tcr_embedding(x, table)
    out = jax.block_until_ready(out)

    ref = jnp.take(table, x, axis=0)
    assert out.shape == (batch, seq_len, EMBED_DIM)
    assert jnp.allclose(out, ref, atol=1e-5), "mismatch vs reference gather"

    # Second check with multiple grid steps (small tile) to exercise pipelining.
    x2 = jax.random.randint(k_idx2, (4, 96), 0, VOCAB_SIZE, dtype=jnp.int32)
    out2 = jax.block_until_ready(tcr_embedding(x2, table, tile_rows=8))
    ref2 = jnp.take(table, x2, axis=0)
    assert jnp.allclose(out2, ref2, atol=1e-5), "mismatch vs reference gather (tiled)"

    print("KERNEL_OK")
</pallas_src>

<mosaic_0001>
module attributes {stable_mosaic.version = 11 : i64} {
  func.func @embed_kernel(%arg0: i32, %arg1: memref<8x4xi32, #tpu.memory_space<vmem>>, %arg2: memref<128x128xf32, #tpu.memory_space<vmem>>, %arg3: memref<8x128xf32, #tpu.memory_space<vmem>>) attributes {dimension_semantics = [#tpu.dimension_semantics<parallel>], iteration_bounds = array<i64: 1>, scalar_prefetch = 0 : i64, scratch_operands = 0 : i64, tpu.core_type = #tpu.core_type<tc>, window_params = [{transform_indices = @transform_0, window_bounds = array<i64: 8, 4>}, {pipeline_mode = #tpu.pipeline_mode<synchronous>, transform_indices = @transform_1, window_bounds = array<i64: 128, 128>}, {transform_indices = @transform_2, window_bounds = array<i64: 8, 128>}]} {
    %c0 = arith.constant 0 : index
    %c0_0 = arith.constant 0 : index
    %0 = vector.load %arg1[%c0, %c0_0] : memref<8x4xi32, #tpu.memory_space<vmem>>, vector<8x4xi32>
    %1 = tpu.iota {dimensions = array<i32: 1>} : vector<8x128xi32>
    %2 = vector.extract_strided_slice %0 {offsets = [0, 0], sizes = [8, 1], strides = [1, 1]} : vector<8x4xi32> to vector<8x1xi32>
    %3 = vector.broadcast %2 : vector<8x1xi32> to vector<8x128xi32>
    %4 = arith.cmpi eq, %1, %3 : vector<8x128xi32>
    %5 = vector.extract_strided_slice %0 {offsets = [0, 1], sizes = [8, 1], strides = [1, 1]} : vector<8x4xi32> to vector<8x1xi32>
    %6 = vector.broadcast %5 : vector<8x1xi32> to vector<8x128xi32>
    %7 = arith.cmpi eq, %1, %6 : vector<8x128xi32>
    %8 = arith.ori %4, %7 : vector<8x128xi1>
    %9 = vector.extract_strided_slice %0 {offsets = [0, 2], sizes = [8, 1], strides = [1, 1]} : vector<8x4xi32> to vector<8x1xi32>
    %10 = vector.broadcast %9 : vector<8x1xi32> to vector<8x128xi32>
    %11 = arith.cmpi eq, %1, %10 : vector<8x128xi32>
    %12 = arith.ori %8, %11 : vector<8x128xi1>
    %13 = vector.extract_strided_slice %0 {offsets = [0, 3], sizes = [8, 1], strides = [1, 1]} : vector<8x4xi32> to vector<8x1xi32>
    %14 = vector.broadcast %13 : vector<8x1xi32> to vector<8x128xi32>
    %15 = arith.cmpi eq, %1, %14 : vector<8x128xi32>
    %16 = arith.ori %12, %15 : vector<8x128xi1>
    %17 = arith.extui %16 : vector<8x128xi1> to vector<8x128xi32>
    %18 = arith.sitofp %17 : vector<8x128xi32> to vector<8x128xf32>
    %c0_1 = arith.constant 0 : index
    %c0_2 = arith.constant 0 : index
    %19 = vector.load %arg2[%c0_1, %c0_2] : memref<128x128xf32, #tpu.memory_space<vmem>>, vector<128x128xf32>
    %cst = arith.constant dense<0.000000e+00> : vector<8x128xf32>
    %20 = tpu.matmul %18, %19, %cst {dimension_numbers = #tpu.dot_dimension_numbers<[1], [0], [0], [1], [0, 0, 1, 1], [], []>} : vector<8x128xf32>, vector<128x128xf32>, vector<8x128xf32> -> vector<8x128xf32>
    %c0_3 = arith.constant 0 : index
    %c0_4 = arith.constant 0 : index
    %21 = vector.load %arg3[%c0_3, %c0_4] : memref<8x128xf32, #tpu.memory_space<vmem>>, vector<8x128xf32>
    tpu.vector_store %arg3[%c0_3, %c0_4], %20 {strides = array<i32>} : memref<8x128xf32, #tpu.memory_space<vmem>>, vector<8x128xf32>,
    return
  }
  func.func @transform_0(%arg0: i32) -> (i32, i32) {
    %c0_i32 = arith.constant 0 : i32
    %c0_i32_0 = arith.constant 0 : i32
    return %arg0, %c0_i32 : i32, i32
  }
  func.func @transform_1(%arg0: i32) -> (i32, i32) {
    %c0_i32 = arith.constant 0 : i32
    %c0_i32_0 = arith.constant 0 : i32
    %c0_i32_1 = arith.constant 0 : i32
    return %c0_i32, %c0_i32_0 : i32, i32
  }
  func.func @transform_2(%arg0: i32) -> (i32, i32) {
    %c0_i32 = arith.constant 0 : i32
    %c0_i32_0 = arith.constant 0 : i32
    return %arg0, %c0_i32 : i32, i32
  }
}

</mosaic_0001>

<bundles_post_ra>
// kernel: tpu_custom_call.1
= control target key start
LH: loop header
LB: loop body
LE: loop exit
PB: predicated region body
PF: predicated region fallthrough
CT: control target
= control target key end

     0   :  { %7 = vsyncpa [#allocation3], 0  ;;  %s349_s0 = inlined_call_operand.vmem [shape: s32[8,4], index: 0, kind: input, shape index: {}]   ;;  %s350_s1 = inlined_call_operand.hbm [shape: f32[128,128], index: 1, kind: input, shape index: {}]   ;;  %s351_s2 = inlined_call_operand.hbm [shape: f32[8,128], index: 2, kind: output, shape index: {}]  }
   0x1   :  { %8 = vsyncpa [#allocation4], 0  ;;  %s295_s9 = smov [#allocation2]   ;;  %s247_s13 = scalar_lea.hbm %s350_s1, 2048 }
   0x2   :  { %s16_s10 = sshll.u32 %s295_s9, 4  ;;  %p248_p0 = scmp.ne.s32.totalorder %s350_s1, %s247_s13  ;;  %s17_s10 = int_to_ptr.vmem [resolvable:$true] %s16_s10 }
   0x3   :  { %p251_p1 = scmp.lt.u32.totalorder %s247_s13, %s350_s1 }
   0x5   :  { %p253_p2 = pnand %p251_p1, %p248_p0 }
   0x7   :  { %256 = shalt.err (!%p253_p2)
}
   0x8   :  { %s257_s18 = scalar_lea.vmem %s17_s10, 2048  ;;  %p262_p4 = scmp.lt.s32.totalorder %s17_s10, %s17_s10 }
   0x9   :  { %p258_p3 = scmp.ne.s32.totalorder %s17_s10, %s257_s18  ;;  %p263_p5 = scmp.lt.s32.totalorder %s257_s18, %s257_s18 }
   0xb   :  { %p264_p6 = por %p263_p5, %p262_p4 }
   0xd   :  { %p265_p7 = pnand %p264_p6, %p258_p3 }
   0xf   :  { %268 = shalt.err (!%p265_p7)
}
  0x10   :  { %s296_s19 = smov 128   ;;  %s297_s20 = smov 8  }
  0x11   :  { %22 = dma.hbm_to_vmem [thread:$0]  %s350_s1, 2048, %s17_s10, [#allocation3], %s296_s19, %s296_s19, %s297_s20  }
  0x12   :  { %291 = dma.done.wait [#allocation3], 2048  }
  0x13   :  { %292 = vsyncadd [#allocation3], 4294965248  ;;  %v298_v0 = vmov 0   ;;  %v299_v1 = vmov 2   ;;  %v300_v2 = vmov 0.0|0.0   ;;  %v26_v3 = vld [vmem:[%s349_s0] sm:$0xff]  ;;  %v27_v31 = vlaneseq }
  0x14   :  { %242 = vset.pattern.permute.xlu0 %v298_v0  ;;  %244 = vset.pattern.permute.xlu1 %v299_v1  ;;  %v50_v4 = vld [vmem:[#allocation2] sm:$0xff]  ;;  %v51_v5 = vld [vmem:[#allocation2 + $0x8] sm:$0xff]  ;;  %v52_v7 = vld [vmem:[#allocation2 + $0x10] sm:$0xff]  ;;  %v301_v12 = vmov 1   ;;  %v302_v13 = vmov 3   ;;  %vm303_vm0 = vmmov 0  }
  0x15   :  { %206 = vmatprep.subr.bf16.mxu0 %v300_v2  ;;  %30 = vperm.xlu0 %242, %v26_v3   ;;  %v207_v6 = vpack.c.bf16 %v51_v5, %v50_v4  ;;  %v53_v8 = vld [vmem:[#allocation2 + $0x18] sm:$0xff]  ;;  %v54_v10 = vld [vmem:[#allocation2 + $0x20] sm:$0xff]  ;;  %v55_v11 = vld [vmem:[#allocation2 + $0x28] sm:$0xff]  ;;  %v304_v17 = vmov 0.0   ;;  %v28_v34 = vand.u32 127, %v27_v31  ;;  %v305_v37 = vmov 1.0  }
  0x16   :  { %39 = vperm.xlu1 %244, %v26_v3   ;;  %v210_v9 = vpack.c.bf16 %v53_v8, %v52_v7  ;;  %v213_v14 = vpack.c.bf16 %v55_v11, %v54_v10  ;;  %v56_v15 = vld [vmem:[#allocation2 + $0x30] sm:$0xff]  ;;  %v57_v16 = vld [vmem:[#allocation2 + $0x38] sm:$0xff]  ;;  %203 = vmatprep.mubr.msk.f32.mxu0 %vm303_vm0, %v304_v17  ;;  %v58_v19 = vld [vmem:[#allocation2 + $0x40] sm:$0xff]  ;;  %s306_s0 = smov [#allocation5]  }
  0x17   :  { %208 = vmatpush3.bf16.msra.mxu0 %v207_v6  ;;  %v216_v18 = vpack.c.bf16 %v57_v16, %v56_v15  ;;  %v59_v20 = vld [vmem:[#allocation2 + $0x48] sm:$0xff]  ;;  %v60_v22 = vld [vmem:[#allocation2 + $0x50] sm:$0xff]  ;;  %v61_v23 = vld [vmem:[#allocation2 + $0x58] sm:$0xff]  ;;  %s143_s1 = sshll.u32 %s306_s0, 4  ;;  %s144_s1 = int_to_ptr.vmem [resolvable:$true] %s143_s1 }
  0x18   :  { %209 = vmatprep.subr.bf16.mxu0 %v300_v2  ;;  %v219_v21 = vpack.c.bf16 %v59_v20, %v58_v19  ;;  %v222_v24 = vpack.c.bf16 %v61_v23, %v60_v22  ;;  %v62_v25 = vld [vmem:[#allocation2 + $0x60] sm:$0xff]  ;;  %v63_v26 = vld [vmem:[#allocation2 + $0x68] sm:$0xff]  ;;  %v64_v28 = vld [vmem:[#allocation2 + $0x70] sm:$0xff]  ;;  %s269_s25 = scalar_lea.vmem %s144_s1, 128  ;;  %p274_p9 = scmp.lt.s32.totalorder %s144_s1, %s144_s1 }
  0x19   :  { %243 = vset.pattern.permute.xlu0 %v301_v12  ;;  %v225_v27 = vpack.c.bf16 %v63_v26, %v62_v25  ;;  %v65_v29 = vld [vmem:[#allocation2 + $0x78] sm:$0xff]  ;;  %p270_p8 = scmp.ne.s32.totalorder %s144_s1, %s269_s25  ;;  %p275_p10 = scmp.lt.s32.totalorder %s269_s25, %s269_s25 }
  0x1a   :  { %245 = vset.pattern.permute.xlu1 %v302_v13  ;;  %34 = vperm.xlu0 %243, %v26_v3   ;;  %v228_v30 = vpack.c.bf16 %v65_v29, %v64_v28 }
  0x1b   :  { %44 = vperm.xlu1 %245, %v26_v3   ;;  %211 = vmatpush3.bf16.msra.mxu0 %v210_v9  ;;  %p276_p11 = por %p275_p10, %p274_p9 }
  0x1c   :  { %212 = vmatprep.subr.bf16.mxu0 %v300_v2 }
  0x1d   :  { %p277_p12 = pnand %p276_p11, %p270_p8 }
  0x1e   :  { %246 = vset.pattern.permute.xlu0 %v302_v13 }
  0x1f   :  { %214 = vmatpush3.bf16.msra.mxu0 %v213_v14 }
  0x20   :  { %215 = vmatprep.subr.bf16.mxu0 %v300_v2 }
  0x23   :  { %217 = vmatpush3.bf16.msra.mxu0 %v216_v18 }
  0x24   :  { %218 = vmatprep.subr.bf16.mxu0 %v300_v2 }
  0x27   :  { %220 = vmatpush3.bf16.msra.mxu0 %v219_v21 }
  0x28   :  { %221 = vmatprep.subr.bf16.mxu0 %v300_v2 }
  0x2b   :  { %223 = vmatpush3.bf16.msra.mxu0 %v222_v24 }
  0x2c   :  { %224 = vmatprep.subr.bf16.mxu0 %v300_v2 }
  0x2f   :  { %226 = vmatpush3.bf16.msra.mxu0 %v225_v27 }
  0x30   :  { %227 = vmatprep.subr.bf16.mxu0 %v300_v2 }
  0x33   :  { %229 = vmatpush3.bf16.msra.mxu0 %v228_v30 }
  0x94   :  { %v31_v32 = vpop.permute.xlu0 %30 }
  0x95   :  { %v40_v33 = vpop.permute.xlu1 %39  ;;  %vm32_vm1 = vcmp.eq.s32.totalorder %v28_v34, %v31_v32 }
  0x96   :  { %vm41_vm4 = vcmp.eq.s32.totalorder %v28_v34, %v40_v33 }
  0x99   :  { %v35_v35 = vpop.permute.xlu0 %34 }
  0x9a   :  { %v45_v36 = vpop.permute.xlu1 %44  ;;  %vm36_vm2 = vcmp.eq.s32.totalorder %v28_v34, %v35_v35 }
  0x9b   :  { %vm46_vm3 = vcmp.eq.s32.totalorder %v28_v34, %v45_v36  ;;  %vm37_vm5 = vmor %vm32_vm1, %vm36_vm2 }
  0x9c   :  { %vm42_vm6 = vmor %vm37_vm5, %vm41_vm4 }
  0x9d   :  { %vm47_vm7 = vmor %vm42_vm6, %vm46_vm3 }
  0x9e   :  { %204 = vmatmul.mubr.msk.f32.vlgmr.msra.gmra.mrb[0].mxu0 %vm47_vm7, %v305_v37 }
 0x171   :  { %v132_v38 = vpop.f32.mrb[0].mxu0 }
 0x172   :  { %136 = vst [vmem:[#allocation5] sm:$0xff] %v132_v38  ;;  %v205_v39 = vpop.f32.mrb[1].mxu0 }
 0x173   :  { %280 = shalt.err (!%p277_p12)
}
 0x174   :  { %s281_s28 = scalar_lea.hbm %s351_s2, 128 }
 0x175   :  { %p282_p13 = scmp.ne.s32.totalorder %s351_s2, %s281_s28  ;;  %p285_p0 = scmp.lt.u32.totalorder %s281_s28, %s351_s2 }
 0x177   :  { %p287_p1 = pnand %p285_p0, %p282_p13 }
 0x179   :  { %290 = shalt.err (!%p287_p1)
}
 0x17a   :  { %146 = dma.vmem_to_hbm [thread:$0]  %s144_s1, 128, %s351_s2, [#allocation4]  }
 0x17b   :  { %293 = dma.done.wait [#allocation4], 128  }
 0x17c   :  { %294 = vsyncadd [#allocation4], 4294967168 }
 0x17d   :  { %150 = vsyncpa [#allocation3], 1 }
 0x17e   :  { %151 = vsyncpa [#allocation4], 1 }

</bundles_post_ra>
